<compile_context>
chip_gen: v5e
topology: v5e:2x2
jax: 0.10.0
libtpu: 0.0.40
codegen_flags: <defaults>
</compile_context>

<pallas_src>
import jax
import jax.numpy as jnp
from jax.experimental import pallas as pl
from jax.experimental.pallas import tpu as pltpu


def _fused_mlp_kernel(x_ref, w0_ref, b0_ref, wf_ref, bf_ref, o_ref):
    # Base layer 0: Linear(in_dim, hidden) + ReLU, f32 accumulation on the MXU.
    h = jnp.dot(x_ref[...], w0_ref[...], preferred_element_type=jnp.float32)
    h = jnp.maximum(h + b0_ref[...], 0.0)
    # Fused trailing affines: Linear(hidden, current) folded into
    # Linear(current, out) -> a single Linear(hidden, out).
    o = jnp.dot(h.astype(wf_ref.dtype), wf_ref[...],
                preferred_element_type=jnp.float32)
    o_ref[...] = (o + bf_ref[...]).astype(o_ref.dtype)


def prepare_fused_params(params, compute_dtype=None):
    """Fold the two trailing affine layers (no activation between them):
       (h @ w1 + b1) @ w2 + b2 == h @ (w1 @ w2) + (b1 @ w2 + b2).
    Call once per parameter set and reuse across forward calls (hoisted out of
    the per-call path). Biases stay f32; weights optionally cast (tiny)."""
    w0, b0 = params["w0"], params["b0"]
    w1, b1 = params["w1"], params["b1"]
    w2, b2 = params["w2"], params["b2"]
    w_f = jnp.dot(w1, w2, preferred_element_type=jnp.float32)
    b_f = jnp.dot(b1, w2, preferred_element_type=jnp.float32) + b2
    if compute_dtype is not None:
        w0 = w0.astype(compute_dtype)
        w_f = w_f.astype(compute_dtype)
    return {"w0": w0, "b0": b0.astype(jnp.float32),
            "w_f": w_f.astype(w0.dtype), "b_f": b_f.astype(jnp.float32)}


def with_finetune_layers_forward(x, fused, *, block_batch=None):
    """Forward of WithFinetuneLayers(SimpleMLP(32,16,[64]), 16, 2, []).

    x: (B, in_dim). fused: output of prepare_fused_params. Compute dtype for
    the matmuls is x.dtype (no wrapper-side activation cast)."""
    B, in_dim = x.shape
    # Weights ride in x's dtype (no-op if prepare_fused_params already matched).
    w0 = fused["w0"].astype(x.dtype)
    w_f = fused["w_f"].astype(x.dtype)
    b0 = fused["b0"]
    b_f = fused["b_f"]
    hidden = w0.shape[1]
    out_dim = w_f.shape[1]

    # --- Batch tiling: >= 2 tiles when B allows (v7x: 2 TCs share the
    # "parallel" batch axis), multiple of 8 sublanes, capped at 8192 rows.
    if block_batch is None:
        block_batch = min(8192, max(8, ((pl.cdiv(B, 2) + 7) // 8) * 8))
    block_batch = max(8, (block_batch // 8) * 8)
    n_tiles = pl.cdiv(B, block_batch)  # ragged last tile masked by Pallas

    xsz = jnp.dtype(x.dtype).itemsize

    # --- Explicit VMEM budget (double-buffered x and out + resident weights
    # + in-kernel f32 intermediates), with 2x headroom. Stays well inside
    # v5e's 16 MiB scoped default and v7x's 64 MiB physical VMEM.
    vmem_need = (2 * block_batch * in_dim * xsz            # x, double-buffered
                 + 2 * block_batch * out_dim * xsz          # out, double-buffered
                 + 2 * (w0.size + w_f.size) * xsz           # resident weights
                 + 2 * (b0.size + b_f.size) * 4             # resident biases
                 + block_batch * hidden * 4                 # h (f32)
                 + block_batch * out_dim * 4)               # f32 acc
    vmem_limit = min(64 * 1024 * 1024, max(16 * 1024 * 1024, 2 * vmem_need))

    cost = pl.CostEstimate(
        flops=2 * B * (in_dim * hidden + hidden * out_dim),
        transcendentals=0,
        bytes_accessed=(x.size * xsz + w0.size * xsz + w_f.size * xsz
                        + b0.size * 4 + b_f.size * 4 + B * out_dim * xsz),
    )

    def resident(shape):
        # Weights/biases: same block every grid step -> stay VMEM-resident.
        return pl.BlockSpec(shape, lambda i: (0, 0))

    out = pl.pallas_call(
        _fused_mlp_kernel,
        out_shape=jax.ShapeDtypeStruct((B, out_dim), x.dtype),
        grid=(n_tiles,),
        in_specs=[
            pl.BlockSpec((block_batch, in_dim), lambda i: (i, 0)),
            resident(w0.shape), resident(b0.shape),
            resident(w_f.shape), resident(b_f.shape),
        ],
        # Block last dim == full array dim (out_dim) -> legal; masked store is
        # free here and avoids all padded-output HBM traffic.
        out_specs=pl.BlockSpec((block_batch, out_dim), lambda i: (i, 0)),
        compiler_params=pltpu.CompilerParams(
            dimension_semantics=("parallel",),
            vmem_limit_bytes=int(vmem_limit)),
        cost_estimate=cost,
    )(x, w0, b0, w_f, b_f)

    return out


def init_params(key, in_dim=32, hidden=64, current_size=16, output_size=2):
    """Deterministic init mimicking nn.Linear's uniform(-1/sqrt(fan_in), +)."""
    ks = jax.random.split(key, 6)

    def linear(kw, kb, fan_in, fan_out):
        bound = 1.0 / jnp.sqrt(jnp.float32(fan_in))
        w = jax.random.uniform(kw, (fan_in, fan_out), jnp.float32, -bound, bound)
        b = jax.random.uniform(kb, (1, fan_out), jnp.float32, -bound, bound)
        return w, b

    w0, b0 = linear(ks[0], ks[1], in_dim, hidden)
    w1, b1 = linear(ks[2], ks[3], hidden, current_size)
    w2, b2 = linear(ks[4], ks[5], current_size, output_size)
    return {"w0": w0, "b0": b0, "w1": w1, "b1": b1, "w2": w2, "b2": b2}


def _reference(x, p):
    h = jnp.maximum(x @ p["w0"] + p["b0"], 0.0)
    m = h @ p["w1"] + p["b1"]
    return m @ p["w2"] + p["b2"]


if __name__ == "__main__":
    key = jax.random.PRNGKey(0)
    k_x, k_p = jax.random.split(key)

    B, IN_DIM, HIDDEN, CURRENT, OUT = 8, 32, 64, 16, 2
    x = jax.random.normal(k_x, (B, IN_DIM), jnp.float32)
    params = init_params(k_p, IN_DIM, HIDDEN, CURRENT, OUT)

    y_ref = _reference(x, params)

    # Fusion of the trailing affines is precomputed once and reused.
    fused = prepare_fused_params(params)

    # f32 path: preserves the module's forward semantics (the fusion only
    # reassociates the two trailing matmuls).
    fwd = jax.jit(with_finetune_layers_forward)
    y = jax.block_until_ready(fwd(x, fused))
    assert y.shape == (B, OUT)
    assert jnp.allclose(y, y_ref, atol=1e-5, rtol=1e-5)

    # bf16 fast path: only when the caller already has bf16 activations
    # (no wrapper-side cast of x). Quantizes x/w0/w_f inputs to the MXU;
    # biases and accumulation stay f32 — loose tolerance covers it.
    x_bf16 = x.astype(jnp.bfloat16)
    fused_bf16 = prepare_fused_params(params, compute_dtype=jnp.bfloat16)
    y_bf16 = jax.block_until_ready(
        with_finetune_layers_forward(x_bf16, fused_bf16))
    assert y_bf16.shape == (B, OUT)
    assert jnp.allclose(y_bf16.astype(jnp.float32), y_ref, atol=5e-2, rtol=5e-2)

    print("KERNEL_OK")
</pallas_src>

<mosaic_0001>
module attributes {stable_mosaic.version = 11 : i64} {
  func.func @_fused_mlp_kernel(%arg0: i32, %arg1: memref<8x32xf32, #tpu.memory_space<vmem>>, %arg2: memref<32x64xf32, #tpu.memory_space<vmem>>, %arg3: memref<1x64xf32, #tpu.memory_space<vmem>>, %arg4: memref<64x2xf32, #tpu.memory_space<vmem>>, %arg5: memref<1x2xf32, #tpu.memory_space<vmem>>, %arg6: memref<8x2xf32, #tpu.memory_space<vmem>>) attributes {dimension_semantics = [#tpu.dimension_semantics<parallel>], iteration_bounds = array<i64: 1>, scalar_prefetch = 0 : i64, scratch_operands = 0 : i64, tpu.core_type = #tpu.core_type<tc>, window_params = [{transform_indices = @transform_0, window_bounds = array<i64: 8, 32>}, {pipeline_mode = #tpu.pipeline_mode<synchronous>, transform_indices = @transform_1, window_bounds = array<i64: 32, 64>}, {pipeline_mode = #tpu.pipeline_mode<synchronous>, transform_indices = @transform_2, window_bounds = array<i64: 1, 64>}, {pipeline_mode = #tpu.pipeline_mode<synchronous>, transform_indices = @transform_3, window_bounds = array<i64: 64, 2>}, {pipeline_mode = #tpu.pipeline_mode<synchronous>, transform_indices = @transform_4, window_bounds = array<i64: 1, 2>}, {transform_indices = @transform_5, window_bounds = array<i64: 8, 2>}]} {
    %c0 = arith.constant 0 : index
    %c0_0 = arith.constant 0 : index
    %0 = vector.load %arg1[%c0, %c0_0] : memref<8x32xf32, #tpu.memory_space<vmem>>, vector<8x32xf32>
    %c0_1 = arith.constant 0 : index
    %c0_2 = arith.constant 0 : index
    %1 = vector.load %arg2[%c0_1, %c0_2] : memref<32x64xf32, #tpu.memory_space<vmem>>, vector<32x64xf32>
    %cst = arith.constant dense<0.000000e+00> : vector<8x64xf32>
    %2 = tpu.matmul %0, %1, %cst {dimension_numbers = #tpu.dot_dimension_numbers<[1], [0], [0], [1], [0, 0, 1, 1], [], []>} : vector<8x32xf32>, vector<32x64xf32>, vector<8x64xf32> -> vector<8x64xf32>
    %c0_3 = arith.constant 0 : index
    %c0_4 = arith.constant 0 : index
    %3 = vector.load %arg3[%c0_3, %c0_4] : memref<1x64xf32, #tpu.memory_space<vmem>>, vector<1x64xf32>
    %4 = vector.broadcast %3 : vector<1x64xf32> to vector<8x64xf32>
    %5 = arith.addf %2, %4 : vector<8x64xf32>
    %cst_5 = arith.constant 0.000000e+00 : f32
    %6 = vector.broadcast %cst_5 : f32 to vector<8x64xf32>
    %7 = arith.maximumf %5, %6 : vector<8x64xf32>
    %c0_6 = arith.constant 0 : index
    %c0_7 = arith.constant 0 : index
    %8 = vector.load %arg4[%c0_6, %c0_7] : memref<64x2xf32, #tpu.memory_space<vmem>>, vector<64x2xf32>
    %cst_8 = arith.constant dense<0.000000e+00> : vector<8x2xf32>
    %9 = tpu.matmul %7, %8, %cst_8 {dimension_numbers = #tpu.dot_dimension_numbers<[1], [0], [0], [1], [0, 0, 1, 1], [], []>} : vector<8x64xf32>, vector<64x2xf32>, vector<8x2xf32> -> vector<8x2xf32>
    %c0_9 = arith.constant 0 : index
    %c0_10 = arith.constant 0 : index
    %10 = vector.load %arg5[%c0_9, %c0_10] : memref<1x2xf32, #tpu.memory_space<vmem>>, vector<1x2xf32>
    %11 = vector.broadcast %10 : vector<1x2xf32> to vector<8x2xf32>
    %12 = arith.addf %9, %11 : vector<8x2xf32>
    %c0_11 = arith.constant 0 : index
    %c0_12 = arith.constant 0 : index
    %13 = vector.load %arg6[%c0_11, %c0_12] : memref<8x2xf32, #tpu.memory_space<vmem>>, vector<8x2xf32>
    tpu.vector_store %arg6[%c0_11, %c0_12], %12 {strides = array<i32>} : memref<8x2xf32, #tpu.memory_space<vmem>>, vector<8x2xf32>,
    return
  }
  func.func @transform_0(%arg0: i32) -> (i32, i32) {
    %c0_i32 = arith.constant 0 : i32
    %c0_i32_0 = arith.constant 0 : i32
    return %arg0, %c0_i32 : i32, i32
  }
  func.func @transform_1(%arg0: i32) -> (i32, i32) {
    %c0_i32 = arith.constant 0 : i32
    %c0_i32_0 = arith.constant 0 : i32
    %c0_i32_1 = arith.constant 0 : i32
    return %c0_i32, %c0_i32_0 : i32, i32
  }
  func.func @transform_2(%arg0: i32) -> (i32, i32) {
    %c0_i32 = arith.constant 0 : i32
    %c0_i32_0 = arith.constant 0 : i32
    %c0_i32_1 = arith.constant 0 : i32
    return %c0_i32, %c0_i32_0 : i32, i32
  }
  func.func @transform_3(%arg0: i32) -> (i32, i32) {
    %c0_i32 = arith.constant 0 : i32
    %c0_i32_0 = arith.constant 0 : i32
    %c0_i32_1 = arith.constant 0 : i32
    return %c0_i32, %c0_i32_0 : i32, i32
  }
  func.func @transform_4(%arg0: i32) -> (i32, i32) {
    %c0_i32 = arith.constant 0 : i32
    %c0_i32_0 = arith.constant 0 : i32
    %c0_i32_1 = arith.constant 0 : i32
    return %c0_i32, %c0_i32_0 : i32, i32
  }
  func.func @transform_5(%arg0: i32) -> (i32, i32) {
    %c0_i32 = arith.constant 0 : i32
    %c0_i32_0 = arith.constant 0 : i32
    return %arg0, %c0_i32 : i32, i32
  }
}

</mosaic_0001>

<bundles_post_ra>
// kernel: with_finetune_layers_forward.1
= control target key start
LH: loop header
LB: loop body
LE: loop exit
PB: predicated region body
PF: predicated region fallthrough
CT: control target
= control target key end

     0   :  { %vm29_vm0 = vcmask 261120   ;;  %vm66_vm1 = vcmask 523264   ;;  %vm90_vm2 = vcmask 15360   ;;  %s178_s1 = inlined_call_operand.vmem [shape: f32[32,64], index: 1, kind: input, shape index: {}]   ;;  %s179_s3 = inlined_call_operand.vmem [shape: f32[64,2], index: 3, kind: input, shape index: {}]   ;;  %s180_s0 = inlined_call_operand.vmem [shape: f32[8,32], index: 0, kind: input, shape index: {}]   ;;  %s181_s2 = inlined_call_operand.vmem [shape: f32[1,64], index: 2, kind: input, shape index: {}]   ;;  %s182_s4 = inlined_call_operand.vmem [shape: f32[1,2], index: 4, kind: input, shape index: {}]   ;;  %s183_s5 = inlined_call_operand.vmem [shape: f32[8,2], index: 5, kind: output, shape index: {}]  }
   0x1   :  { %v24_v0 = vld [vmem:[%s178_s1 + $0x18] sm:$0xff]  ;;  %v23_v1 = vld [vmem:[%s178_s1 + $0x10] sm:$0xff]  ;;  %v22_v3 = vld [vmem:[%s178_s1 + $0x8] sm:$0xff] }
   0x2   :  { %45 = vmatpush.msra.mxu0 %v24_v0  ;;  %v61_v2 = vld [vmem:[%s179_s3 + $0x38] sm:$0xff]  ;;  %v60_v4 = vld [vmem:[%s179_s3 + $0x30] sm:$0xff]  ;;  %v59_v5 = vld [vmem:[%s179_s3 + $0x28] sm:$0xff] }
   0x3   :  { %78 = vmatpush.msra.mxu1 %v61_v2  ;;  %v21_v6 = vld [vmem:[%s178_s1] sm:$0xff]  ;;  %v57_v9 = vld [vmem:[%s179_s3 + $0x18] sm:$0xff]  ;;  %v56_v10 = vld [vmem:[%s179_s3 + $0x10] sm:$0xff] }
   0x4   :  { %46 = vmatpush.msra.mxu0 %v23_v1  ;;  %v20_v7 = vld [vmem:[%s180_s0] sm:$0xff]  ;;  %v55_v11 = vld [vmem:[%s179_s3 + $0x8] sm:$0xff] }
   0x5   :  { %79 = vmatpush.msra.mxu1 %v60_v4  ;;  %v58_v8 = vld [vmem:[%s179_s3 + $0x20] sm:$0xff] }
   0x6   :  { %47 = vmatpush.msra.mxu0 %v22_v3  ;;  %v54_v12 = vld [vmem:[%s179_s3] sm:$0xff] }
   0x7   :  { %80 = vmatpush.msra.mxu1 %v59_v5  ;;  %v98_v13 = vld [vmem:[%s181_s2] ss:$0 sm:$0xff] }
   0x8   :  { %48 = vmatpush.msra.mxu0 %v21_v6  ;;  %v99_v17 = vld [vmem:[%s182_s4] ss:$0 sm:$0xff] }
   0x9   :  { %96 = vmatmul.msk.f32.vlgmr.msra.gmra.mxu0 %vm29_vm0, %v20_v7  ;;  %81 = vmatpush.msra.mxu1 %v58_v8 }
   0xb   :  { %82 = vmatpush.msra.mxu1 %v57_v9 }
   0xd   :  { %83 = vmatpush.msra.mxu1 %v56_v10 }
   0xf   :  { %84 = vmatpush.msra.mxu1 %v55_v11 }
  0x11   :  { %85 = vmatpush.msra.mxu1 %v54_v12 }
  0x86   :  { %v50_v14 = vpop.f32.mrf.mxu0 }
  0x87   :  { %v51_v15 = vadd.f32 %v98_v13, %v50_v14 }
  0x89   :  { %v53_v16 = vmax.f32 %v51_v15, 0.0 }
  0x8b   :  { %97 = vmatmul.msk.f32.vlgmr.msra.gmra.mxu1 %vm66_vm1, %v53_v16 }
 0x108   :  { %v87_v18 = vpop.f32.mrf.mxu1 }
 0x109   :  { %v88_v19 = vadd.f32 %v99_v17, %v87_v18 }
 0x10b   :  { %91 = vst.msk [vmem:[%s183_s5] sm:$0xff] %vm90_vm2, %v88_v19 }

</bundles_post_ra>
